<compile_context>
chip_gen: v5e
topology: v5e:2x2
jax: 0.10.0
libtpu: 0.0.40
codegen_flags: <defaults>
</compile_context>

<pallas_src>
import jax
import jax.numpy as jnp
from jax.experimental import pallas as pl
from jax.experimental.pallas import tpu as pltpu


def _round_up(x: int, m: int) -> int:
    return (x + m - 1) // m * m


def dnn_kernel(x_ref, w1_ref, b1_ref, w2_ref, b2_ref, out_ref):
    # x_ref:  (TB, I)  f32   -- one batch tile (native dtype, cast in-kernel)
    # w1_ref: (I, H)   bf16  -- resident across grid steps
    # b1_ref: (1, H)   f32
    # w2_ref: (H, O)   bf16  -- resident across grid steps
    # b2_ref: (1, O)   f32
    # out_ref:(TB, O)  f32   -- compact output (no lane padding)
    x = x_ref[...].astype(jnp.bfloat16)                                # free VPU cast
    h = jnp.dot(x, w1_ref[...], preferred_element_type=jnp.float32)   # MXU, f32 acc
    h = jnp.tanh(h + b1_ref[...])                                      # f32 bias + EUP tanh
    o = jnp.dot(h.astype(jnp.bfloat16), w2_ref[...],
                preferred_element_type=jnp.float32)                     # MXU, f32 acc
    out_ref[...] = (o + b2_ref[...]).astype(out_ref.dtype)


def dnn_forward(x, w1, b1, w2, b2, *, block_b: int = 2048):
    """Fused 2-layer MLP: tanh(x @ w1 + b1) @ w2 + b2.

    x:  (B, input_size)
    w1: (input_size, hidden)   b1: (hidden,)
    w2: (hidden, output)       b2: (output,)
    """
    B, I = x.shape
    H = w1.shape[1]
    O = w2.shape[1]
    out_dtype = x.dtype
    itemsize = jnp.dtype(out_dtype).itemsize

    # Batch tile: multiple of the f32 sublane pack (8), capped at block_b.
    # For small B this collapses the grid to a single step (1 TC chips);
    # callers on v7x can pass a smaller block_b to get >= 2 parallel tiles.
    TB = min(_round_up(block_b, 8), _round_up(B, 8))
    Bp = _round_up(B, TB)
    num_tiles = Bp // TB

    # Only the batch dim is padded, and only if B is not a tile multiple.
    xp = x if Bp == B else jnp.pad(x, ((0, Bp - B), (0, 0)))

    # Weights are tiny (I*H, H*O); cast once to bf16 for MXU operands.
    w1b = w1.astype(jnp.bfloat16)
    w2b = w2.astype(jnp.bfloat16)
    b1f = b1.astype(jnp.float32).reshape(1, H)
    b2f = b2.astype(jnp.float32).reshape(1, O)

    cost = pl.CostEstimate(
        flops=2 * Bp * (I * H + H * O),
        transcendentals=Bp * H,
        bytes_accessed=(xp.size * xp.dtype.itemsize
                        + w1b.size * 2 + w2b.size * 2
                        + b1f.size * 4 + b2f.size * 4
                        + Bp * O * itemsize),
    )

    out_p = pl.pallas_call(
        dnn_kernel,
        out_shape=jax.ShapeDtypeStruct((Bp, O), out_dtype),
        grid_spec=pl.GridSpec(
            grid=(num_tiles,),
            in_specs=[
                pl.BlockSpec((TB, I), lambda i: (i, 0)),   # x: batch-tiled, pipelined
                pl.BlockSpec((I, H), lambda i: (0, 0)),    # W1: resident (full array)
                pl.BlockSpec((1, H), lambda i: (0, 0)),    # b1: resident
                pl.BlockSpec((H, O), lambda i: (0, 0)),    # W2: resident (full array)
                pl.BlockSpec((1, O), lambda i: (0, 0)),    # b2: resident
            ],
            out_specs=pl.BlockSpec((TB, O), lambda i: (i, 0)),
        ),
        compiler_params=pltpu.CompilerParams(
            dimension_semantics=("parallel",),   # batch tiles independent (megacore)
        ),
        cost_estimate=cost,
    )(xp, w1b, b1f, w2b, b2f)

    return out_p if Bp == B else out_p[:B]


if __name__ == "__main__":
    # Shapes consistent with the module: input_size=16, hidden_size=32, output_size=8.
    # block_b=128 gives a 2-step grid so the pipelined batch indexing is exercised.
    batch, input_size, hidden_size, output_size = 256, 16, 32, 8

    key = jax.random.PRNGKey(0)
    k_x, k_w1, k_b1, k_w2, k_b2 = jax.random.split(key, 5)

    x = jax.random.normal(k_x, (batch, input_size), dtype=jnp.float32)

    # Deterministic init matching nn.Linear's default bound 1/sqrt(fan_in),
    # stored pre-transposed as (in, out).
    bound1 = 1.0 / jnp.sqrt(input_size)
    w1 = jax.random.uniform(k_w1, (input_size, hidden_size), jnp.float32, -bound1, bound1)
    b1 = jax.random.uniform(k_b1, (hidden_size,), jnp.float32, -bound1, bound1)
    bound2 = 1.0 / jnp.sqrt(hidden_size)
    w2 = jax.random.uniform(k_w2, (hidden_size, output_size), jnp.float32, -bound2, bound2)
    b2 = jax.random.uniform(k_b2, (output_size,), jnp.float32, -bound2, bound2)

    out = dnn_forward(x, w1, b1, w2, b2, block_b=128)
    jax.block_until_ready(out)

    # Pure-JAX f32 reference (kernel uses bf16 matmul operands with f32 accumulation,
    # so tolerance is relaxed accordingly).
    ref = jnp.tanh(x @ w1 + b1) @ w2 + b2
    assert out.shape == (batch, output_size)
    assert jnp.allclose(out, ref, atol=2e-2, rtol=2e-2), (
        float(jnp.max(jnp.abs(out - ref))))

    print("KERNEL_OK")
</pallas_src>

<mosaic_0001>
module attributes {stable_mosaic.version = 11 : i64} {
  func.func @dnn_kernel(%arg0: i32, %arg1: memref<128x16xf32, #tpu.memory_space<vmem>>, %arg2: memref<16x32xbf16, #tpu.memory_space<vmem>>, %arg3: memref<1x32xf32, #tpu.memory_space<vmem>>, %arg4: memref<32x8xbf16, #tpu.memory_space<vmem>>, %arg5: memref<1x8xf32, #tpu.memory_space<vmem>>, %arg6: memref<128x8xf32, #tpu.memory_space<vmem>>) attributes {dimension_semantics = [#tpu.dimension_semantics<parallel>], iteration_bounds = array<i64: 2>, scalar_prefetch = 0 : i64, scratch_operands = 0 : i64, tpu.core_type = #tpu.core_type<tc>, window_params = [{transform_indices = @transform_0, window_bounds = array<i64: 128, 16>}, {pipeline_mode = #tpu.pipeline_mode<synchronous>, transform_indices = @transform_1, window_bounds = array<i64: 16, 32>}, {pipeline_mode = #tpu.pipeline_mode<synchronous>, transform_indices = @transform_2, window_bounds = array<i64: 1, 32>}, {pipeline_mode = #tpu.pipeline_mode<synchronous>, transform_indices = @transform_3, window_bounds = array<i64: 32, 8>}, {pipeline_mode = #tpu.pipeline_mode<synchronous>, transform_indices = @transform_4, window_bounds = array<i64: 1, 8>}, {transform_indices = @transform_5, window_bounds = array<i64: 128, 8>}]} {
    %c0 = arith.constant 0 : index
    %c0_0 = arith.constant 0 : index
    %0 = vector.load %arg1[%c0, %c0_0] : memref<128x16xf32, #tpu.memory_space<vmem>>, vector<128x16xf32>
    %1 = arith.truncf %0 : vector<128x16xf32> to vector<128x16xbf16>
    %c0_1 = arith.constant 0 : index
    %c0_2 = arith.constant 0 : index
    %2 = vector.load %arg2[%c0_1, %c0_2] : memref<16x32xbf16, #tpu.memory_space<vmem>>, vector<16x32xbf16>
    %cst = arith.constant dense<0.000000e+00> : vector<128x32xf32>
    %3 = tpu.matmul %1, %2, %cst {dimension_numbers = #tpu.dot_dimension_numbers<[1], [0], [0], [1], [0, 0, 1, 1], [], []>} : vector<128x16xbf16>, vector<16x32xbf16>, vector<128x32xf32> -> vector<128x32xf32>
    %c0_3 = arith.constant 0 : index
    %c0_4 = arith.constant 0 : index
    %4 = vector.load %arg3[%c0_3, %c0_4] : memref<1x32xf32, #tpu.memory_space<vmem>>, vector<1x32xf32>
    %5 = vector.broadcast %4 : vector<1x32xf32> to vector<128x32xf32>
    %6 = arith.addf %3, %5 : vector<128x32xf32>
    %7 = math.tanh %6 : vector<128x32xf32>
    %8 = arith.truncf %7 : vector<128x32xf32> to vector<128x32xbf16>
    %c0_5 = arith.constant 0 : index
    %c0_6 = arith.constant 0 : index
    %9 = vector.load %arg4[%c0_5, %c0_6] : memref<32x8xbf16, #tpu.memory_space<vmem>>, vector<32x8xbf16>
    %cst_7 = arith.constant dense<0.000000e+00> : vector<128x8xf32>
    %10 = tpu.matmul %8, %9, %cst_7 {dimension_numbers = #tpu.dot_dimension_numbers<[1], [0], [0], [1], [0, 0, 1, 1], [], []>} : vector<128x32xbf16>, vector<32x8xbf16>, vector<128x8xf32> -> vector<128x8xf32>
    %c0_8 = arith.constant 0 : index
    %c0_9 = arith.constant 0 : index
    %11 = vector.load %arg5[%c0_8, %c0_9] : memref<1x8xf32, #tpu.memory_space<vmem>>, vector<1x8xf32>
    %12 = vector.broadcast %11 : vector<1x8xf32> to vector<128x8xf32>
    %13 = arith.addf %10, %12 : vector<128x8xf32>
    %c0_10 = arith.constant 0 : index
    %c0_11 = arith.constant 0 : index
    %14 = vector.load %arg6[%c0_10, %c0_11] : memref<128x8xf32, #tpu.memory_space<vmem>>, vector<128x8xf32>
    tpu.vector_store %arg6[%c0_10, %c0_11], %13 {strides = array<i32>} : memref<128x8xf32, #tpu.memory_space<vmem>>, vector<128x8xf32>,
    return
  }
  func.func @transform_0(%arg0: i32) -> (i32, i32) {
    %c0_i32 = arith.constant 0 : i32
    %c0_i32_0 = arith.constant 0 : i32
    return %arg0, %c0_i32 : i32, i32
  }
  func.func @transform_1(%arg0: i32) -> (i32, i32) {
    %c0_i32 = arith.constant 0 : i32
    %c0_i32_0 = arith.constant 0 : i32
    %c0_i32_1 = arith.constant 0 : i32
    return %c0_i32, %c0_i32_0 : i32, i32
  }
  func.func @transform_2(%arg0: i32) -> (i32, i32) {
    %c0_i32 = arith.constant 0 : i32
    %c0_i32_0 = arith.constant 0 : i32
    %c0_i32_1 = arith.constant 0 : i32
    return %c0_i32, %c0_i32_0 : i32, i32
  }
  func.func @transform_3(%arg0: i32) -> (i32, i32) {
    %c0_i32 = arith.constant 0 : i32
    %c0_i32_0 = arith.constant 0 : i32
    %c0_i32_1 = arith.constant 0 : i32
    return %c0_i32, %c0_i32_0 : i32, i32
  }
  func.func @transform_4(%arg0: i32) -> (i32, i32) {
    %c0_i32 = arith.constant 0 : i32
    %c0_i32_0 = arith.constant 0 : i32
    %c0_i32_1 = arith.constant 0 : i32
    return %c0_i32, %c0_i32_0 : i32, i32
  }
  func.func @transform_5(%arg0: i32) -> (i32, i32) {
    %c0_i32 = arith.constant 0 : i32
    %c0_i32_0 = arith.constant 0 : i32
    return %arg0, %c0_i32 : i32, i32
  }
}

</mosaic_0001>

<bundles_post_ra>
// kernel: tpu_custom_call.1
= control target key start
LH: loop header
LB: loop body
LE: loop exit
PB: predicated region body
PF: predicated region fallthrough
CT: control target
= control target key end

     0   :  { %s655_s18 = smov 0   ;;  %s762_s0 = inlined_call_operand.vmem [shape: f32[256,16], index: 0, kind: input, shape index: {}]   ;;  %s763_s1 = inlined_call_operand.vmem [shape: bf16[16,32], index: 1, kind: input, shape index: {}]   ;;  %s764_s2 = inlined_call_operand.vmem [shape: f32[1,32], index: 2, kind: input, shape index: {}]   ;;  %s765_s3 = inlined_call_operand.vmem [shape: bf16[32,8], index: 3, kind: input, shape index: {}]   ;;  %s766_s4 = inlined_call_operand.vmem [shape: f32[1,8], index: 4, kind: input, shape index: {}]   ;;  %s767_s5 = inlined_call_operand.vmem [shape: f32[256,8], index: 5, kind: output, shape index: {}]  }
   0x1 LB: > { %s530_s19 = sadd.s32 4294967295, %s623_s18   ;;  %p534_p0 = scmp.ge.s32.totalorder %s623_s18, 1  ;;  %s623_s18 = sphi %s655_s18, %s15_s18  }
   0x2   : > { %p188_p1 = scmp.lt.s32.totalorder %s623_s18, 3 }
   0x4   : > { %p189_p2 = pnand %p534_p0, %p188_p1 }
   0x5   : > { %s535_s22 = sshll.u32 (!%p189_p2), %s530_s19, 4 }
   0x6   : > { %192 = sbr.rel (%p189_p2) target bundleno = 417 (0x1a1), region = 40  ;;  %p217_p3 = scmp.lt.s32.totalorder (!%p189_p2), %s535_s22, 31 }
   0xb   : > { %v569_v0 = vld [vmem:[%s763_s1] sm:$0xff]  ;;  %s769_s22 = smov (!%p217_p3, %s535_s22), 31  ;;  %vm265_vm0 = vcmask 130048   ;;  %v571_v25 = vld [vmem:[%s765_s3 + $0x8] sm:$0xff]  ;;  %vm383_vm1 = vcmask 261120   ;;  %vm457_vm2 = vcmask 64512  }
   0xc   : > { %297 = vmatpush.bf16.msra.mxu0 %v569_v0  ;;  %572 = vmatpush.bf16.msra.mxu3 %v569_v0  ;;  %s536_s23 = sshll.u32 %s769_s22, 3  ;;  %v570_v26 = vld [vmem:[%s765_s3] sm:$0xff] }
   0xd   : > { %s220_s26 = scalar_lea.vmem %s762_s0, %s536_s23  ;;  %414 = vmatpush.bf16.msra.mxu1 %v571_v25  ;;  %573 = vmatpush.bf16.msra.mxu2 %v571_v25  ;;  %v691_v28 = vld [vmem:[%s764_s2] ss:$0 sm:$0xff]  ;;  %s725_s12 = scalar_lea.vmem %s767_s5, %s536_s23 }
   0xe   : > { %v229_v1 = vld [vmem:[%s220_s26] sm:$0xff]  ;;  %v230_v2 = vld [vmem:[%s220_s26 + $0x8] sm:$0xff]  ;;  %v231_v4 = vld [vmem:[%s220_s26 + $0x10] sm:$0xff] }
   0xf   : > { %v245_v3 = vpack.c.bf16 %v230_v2, %v229_v1  ;;  %v232_v5 = vld [vmem:[%s220_s26 + $0x18] sm:$0xff]  ;;  %v233_v7 = vld [vmem:[%s220_s26 + $0x20] sm:$0xff]  ;;  %v234_v8 = vld [vmem:[%s220_s26 + $0x28] sm:$0xff] }
  0x10   : > { %v246_v6 = vpack.c.bf16 %v232_v5, %v231_v4  ;;  %v247_v9 = vpack.c.bf16 %v234_v8, %v233_v7  ;;  %v239_v10 = vld [vmem:[%s220_s26 + $0x50] sm:$0xff]  ;;  %v240_v11 = vld [vmem:[%s220_s26 + $0x58] sm:$0xff]  ;;  %v241_v15 = vld [vmem:[%s220_s26 + $0x60] sm:$0xff] }
  0x11   : > { %543 = vmatmul.msk.bf16.vlgmr.msra.gmra.mxu0 %vm265_vm0, %v245_v3  ;;  %v250_v12 = vpack.c.bf16 %v240_v11, %v239_v10  ;;  %v235_v13 = vld [vmem:[%s220_s26 + $0x30] sm:$0xff]  ;;  %v236_v14 = vld [vmem:[%s220_s26 + $0x38] sm:$0xff]  ;;  %v242_v16 = vld [vmem:[%s220_s26 + $0x68] sm:$0xff]  ;;  %415 = vmatpush.bf16.msra.mxu1 %v570_v26 }
  0x12   : > { %v248_v17 = vpack.c.bf16 %v236_v14, %v235_v13  ;;  %v251_v18 = vpack.c.bf16 %v242_v16, %v241_v15  ;;  %v237_v19 = vld [vmem:[%s220_s26 + $0x40] sm:$0xff]  ;;  %v238_v20 = vld [vmem:[%s220_s26 + $0x48] sm:$0xff]  ;;  %v243_v21 = vld [vmem:[%s220_s26 + $0x70] sm:$0xff]  ;;  %574 = vmatpush.bf16.msra.mxu2 %v570_v26 }
  0x13   : > { %548 = vmatmul.msk.bf16.vlgmr.msra.gmra.mxu3 %vm265_vm0, %v250_v12  ;;  %v244_v22 = vld [vmem:[%s220_s26 + $0x78] sm:$0xff]  ;;  %v249_v23 = vpack.c.bf16 %v238_v20, %v237_v19  ;;  %v584_v20 = vld [vmem:[%s766_s4] ss:$0 sm:$0xff] }
  0x14   : > { %v252_v24 = vpack.c.bf16 %v244_v22, %v243_v21 }
  0x21   : > { %544 = vmatmul.msk.bf16.gmra.mxu0 %vm265_vm0, %v246_v6 }
  0x23   : > { %549 = vmatmul.msk.bf16.gmra.mxu3 %vm265_vm0, %v251_v18 }
  0x31   : > { %545 = vmatmul.msk.bf16.gmra.mxu0 %vm265_vm0, %v247_v9 }
  0x33   : > { %550 = vmatmul.msk.bf16.gmra.mxu3 %vm265_vm0, %v252_v24 }
  0x41   : > { %546 = vmatmul.msk.bf16.gmra.mxu0 %vm265_vm0, %v248_v17 }
  0x51   : > { %547 = vmatmul.msk.bf16.gmra.mxu0 %vm265_vm0, %v249_v23 }
  0x8e   : > { %v299_v27 = vpop.f32.mrf.mxu0 }
  0x8f   : > { %v300_v29 = vadd.f32 %v691_v28, %v299_v27 }
  0x91   : > { %585 = vtanh.f32 %v300_v29 }
  0x96   : > { %v301_v30 = vpop.f32.mrf.mxu0  ;;  %v324_v55 = vpop.f32.mrf.mxu3 }
  0x97   : > { %v302_v31 = vadd.f32 %v691_v28, %v301_v30  ;;  %v586_v32 = vpop.eup %585  ;;  %v325_v1 = vadd.f32 %v691_v28, %v324_v55 }
  0x99   : > { %587 = vtanh.f32 %v302_v31 }
  0x9e   : > { %v304_v33 = vpop.f32.mrf.mxu0  ;;  %v326_v61 = vpop.f32.mrf.mxu3 }
  0x9f   : > { %v588_v34 = vpop.eup %587  ;;  %v305_v36 = vadd.f32 %v691_v28, %v304_v33  ;;  %v327_v3 = vadd.f32 %v691_v28, %v326_v61 }
  0xa0   : > { %v355_v35 = vpack.c.bf16 %v588_v34, %v586_v32 }
  0xa1   : > { %589 = vtanh.f32 %v305_v36 }
  0xa2   : > { %559 = vmatmul.msk.bf16.vlgmr.msra.gmra.mxu1 %vm383_vm1, %v355_v35 }
  0xa6   : > { %v306_v37 = vpop.f32.mrf.mxu0  ;;  %v329_v2 = vpop.f32.mrf.mxu3 }
  0xa7   : > { %v307_v38 = vadd.f32 %v691_v28, %v306_v37  ;;  %v590_v39 = vpop.eup %589  ;;  %v330_v8 = vadd.f32 %v691_v28, %v329_v2 }
  0xa9   : > { %591 = vtanh.f32 %v307_v38 }
  0xae   : > { %v309_v40 = vpop.f32.mrf.mxu0  ;;  %v331_v5 = vpop.f32.mrf.mxu3 }
  0xaf   : > { %v592_v41 = vpop.eup %591  ;;  %v310_v43 = vadd.f32 %v691_v28, %v309_v40  ;;  %v332_v9 = vadd.f32 %v691_v28, %v331_v5 }
  0xb0   : > { %v356_v42 = vpack.c.bf16 %v592_v41, %v590_v39 }
  0xb1   : > { %593 = vtanh.f32 %v310_v43 }
  0xb2   : > { %560 = vmatmul.msk.bf16.gmra.mxu1 %vm383_vm1, %v356_v42 }
  0xb6   : > { %v311_v44 = vpop.f32.mrf.mxu0  ;;  %v334_v10 = vpop.f32.mrf.mxu3 }
  0xb7   : > { %v312_v45 = vadd.f32 %v691_v28, %v311_v44  ;;  %v594_v46 = vpop.eup %593  ;;  %v335_v15 = vadd.f32 %v691_v28, %v334_v10 }
  0xb9   : > { %595 = vtanh.f32 %v312_v45 }
  0xbe   : > { %v314_v47 = vpop.f32.mrf.mxu0  ;;  %v336_v13 = vpop.f32.mrf.mxu3 }
  0xbf   : > { %v596_v48 = vpop.eup %595  ;;  %v315_v50 = vadd.f32 %v691_v28, %v314_v47  ;;  %v337_v16 = vadd.f32 %v691_v28, %v336_v13 }
  0xc0   : > { %v357_v49 = vpack.c.bf16 %v596_v48, %v594_v46 }
  0xc1   : > { %597 = vtanh.f32 %v315_v50 }
  0xc2   : > { %561 = vmatmul.msk.bf16.gmra.mxu1 %vm383_vm1, %v357_v49 }
  0xc6   : > { %v316_v51 = vpop.f32.mrf.mxu0 }
  0xc7   : > { %v317_v52 = vadd.f32 %v691_v28, %v316_v51  ;;  %v598_v53 = vpop.eup %597 }
  0xc9   : > { %599 = vtanh.f32 %v317_v52 }
  0xce   : > { %v319_v54 = vpop.f32.mrf.mxu0 }
  0xcf   : > { %v600_v56 = vpop.eup %599  ;;  %v320_v58 = vadd.f32 %v691_v28, %v319_v54 }
  0xd0   : > { %v358_v57 = vpack.c.bf16 %v600_v56, %v598_v53 }
  0xd1   : > { %601 = vtanh.f32 %v320_v58 }
  0xd2   : > { %562 = vmatmul.msk.bf16.gmra.mxu1 %vm383_vm1, %v358_v57 }
  0xd6   : > { %v321_v59 = vpop.f32.mrf.mxu0 }
  0xd7   : > { %v322_v60 = vadd.f32 %v691_v28, %v321_v59  ;;  %v602_v62 = vpop.eup %601 }
  0xd9   : > { %603 = vtanh.f32 %v322_v60 }
  0xda   : > { %605 = vtanh.f32 %v325_v1 }
  0xdb   : > { %607 = vtanh.f32 %v327_v3 }
  0xdc   : > { %609 = vtanh.f32 %v330_v8 }
  0xdd   : > { %611 = vtanh.f32 %v332_v9 }
  0xde   : > { %613 = vtanh.f32 %v335_v15 }
  0xdf   : > { %v604_v63 = vpop.eup %603  ;;  %615 = vtanh.f32 %v337_v16 }
  0xe0   : > { %v359_v0 = vpack.c.bf16 %v604_v63, %v602_v62  ;;  %v606_v4 = vpop.eup %605 }
  0xe1   : > { %v608_v6 = vpop.eup %607 }
  0xe2   : > { %563 = vmatmul.msk.bf16.vlgmr.msra.gmra.mxu2 %vm383_vm1, %v359_v0  ;;  %v360_v7 = vpack.c.bf16 %v608_v6, %v606_v4  ;;  %v610_v11 = vpop.eup %609 }
  0xe3   : > { %v612_v12 = vpop.eup %611 }
  0xe4   : > { %v361_v14 = vpack.c.bf16 %v612_v12, %v610_v11  ;;  %v614_v17 = vpop.eup %613 }
  0xe5   : > { %v616_v18 = vpop.eup %615 }
  0xe6   : > { %v362_v19 = vpack.c.bf16 %v616_v18, %v614_v17 }
  0xf2   : > { %564 = vmatmul.msk.bf16.gmra.mxu2 %vm383_vm1, %v360_v7 }
 0x102   : > { %565 = vmatmul.msk.bf16.gmra.mxu2 %vm383_vm1, %v361_v14 }
 0x112   : > { %566 = vmatmul.msk.bf16.gmra.mxu2 %vm383_vm1, %v362_v19 }
 0x11f   : > { %v417_v21 = vpop.f32.mrf.mxu1 }
 0x120   : > { %v418_v22 = vadd.f32 %v584_v20, %v417_v21 }
 0x122   : > { %458 = vst.msk [vmem:[%s725_s12] sm:$0xff] %vm457_vm2, %v418_v22 }
 0x127   : > { %v419_v23 = vpop.f32.mrf.mxu1 }
 0x128   : > { %v420_v24 = vadd.f32 %v584_v20, %v419_v23 }
 0x12a   : > { %459 = vst.msk [vmem:[%s725_s12 + $0x8] sm:$0xff] %vm457_vm2, %v420_v24 }
 0x12f   : > { %v422_v25 = vpop.f32.mrf.mxu1 }
 0x130   : > { %v423_v26 = vadd.f32 %v584_v20, %v422_v25 }
 0x132   : > { %460 = vst.msk [vmem:[%s725_s12 + $0x10] sm:$0xff] %vm457_vm2, %v423_v26 }
 0x137   : > { %v424_v27 = vpop.f32.mrf.mxu1 }
 0x138   : > { %v425_v28 = vadd.f32 %v584_v20, %v424_v27 }
 0x13a   : > { %461 = vst.msk [vmem:[%s725_s12 + $0x18] sm:$0xff] %vm457_vm2, %v425_v28 }
 0x13f   : > { %v427_v29 = vpop.f32.mrf.mxu1 }
 0x140   : > { %v428_v30 = vadd.f32 %v584_v20, %v427_v29 }
 0x142   : > { %462 = vst.msk [vmem:[%s725_s12 + $0x20] sm:$0xff] %vm457_vm2, %v428_v30 }
 0x147   : > { %v429_v31 = vpop.f32.mrf.mxu1 }
 0x148   : > { %v430_v32 = vadd.f32 %v584_v20, %v429_v31 }
 0x14a   : > { %463 = vst.msk [vmem:[%s725_s12 + $0x28] sm:$0xff] %vm457_vm2, %v430_v32 }
 0x14f   : > { %v432_v33 = vpop.f32.mrf.mxu1 }
 0x150   : > { %v433_v34 = vadd.f32 %v584_v20, %v432_v33 }
 0x152   : > { %464 = vst.msk [vmem:[%s725_s12 + $0x30] sm:$0xff] %vm457_vm2, %v433_v34 }
 0x157   : > { %v434_v35 = vpop.f32.mrf.mxu1 }
 0x158   : > { %v435_v36 = vadd.f32 %v584_v20, %v434_v35 }
 0x15a   : > { %465 = vst.msk [vmem:[%s725_s12 + $0x38] sm:$0xff] %vm457_vm2, %v435_v36 }
 0x165   : > { %v437_v37 = vpop.f32.mrf.mxu2 }
 0x166   : > { %v438_v38 = vadd.f32 %v584_v20, %v437_v37 }
 0x168   : > { %466 = vst.msk [vmem:[%s725_s12 + $0x40] sm:$0xff] %vm457_vm2, %v438_v38 }
 0x16d   : > { %v439_v39 = vpop.f32.mrf.mxu2 }
 0x16e   : > { %v440_v40 = vadd.f32 %v584_v20, %v439_v39 }
 0x170   : > { %467 = vst.msk [vmem:[%s725_s12 + $0x48] sm:$0xff] %vm457_vm2, %v440_v40 }
 0x175   : > { %v442_v41 = vpop.f32.mrf.mxu2 }
 0x176   : > { %v443_v42 = vadd.f32 %v584_v20, %v442_v41 }
 0x178   : > { %468 = vst.msk [vmem:[%s725_s12 + $0x50] sm:$0xff] %vm457_vm2, %v443_v42 }
 0x17d   : > { %v444_v43 = vpop.f32.mrf.mxu2 }
 0x17e   : > { %v445_v44 = vadd.f32 %v584_v20, %v444_v43 }
 0x180   : > { %469 = vst.msk [vmem:[%s725_s12 + $0x58] sm:$0xff] %vm457_vm2, %v445_v44 }
 0x185   : > { %v447_v45 = vpop.f32.mrf.mxu2 }
 0x186   : > { %v448_v46 = vadd.f32 %v584_v20, %v447_v45 }
 0x188   : > { %470 = vst.msk [vmem:[%s725_s12 + $0x60] sm:$0xff] %vm457_vm2, %v448_v46 }
 0x18d   : > { %v449_v47 = vpop.f32.mrf.mxu2 }
 0x18e   : > { %v450_v48 = vadd.f32 %v584_v20, %v449_v47 }
 0x190   : > { %471 = vst.msk [vmem:[%s725_s12 + $0x68] sm:$0xff] %vm457_vm2, %v450_v48 }
 0x195   : > { %v452_v49 = vpop.f32.mrf.mxu2 }
 0x196   : > { %v453_v50 = vadd.f32 %v584_v20, %v452_v49 }
 0x198   : > { %472 = vst.msk [vmem:[%s725_s12 + $0x70] sm:$0xff] %vm457_vm2, %v453_v50 }
 0x19d   : > { %v454_v51 = vpop.f32.mrf.mxu2 }
 0x19e   : > { %v455_v52 = vadd.f32 %v584_v20, %v454_v51 }
 0x1a0   : > { %473 = vst.msk [vmem:[%s725_s12 + $0x78] sm:$0xff] %vm457_vm2, %v455_v52 }
 0x1a1 PF: > { %s15_s18 = sadd.s32 1, %s623_s18  }
 0x1a2   : > { %p12_p4 = scmp.ge.s32.totalorder %s15_s18, 4  }
 0x1a4   :  { %14 = sbr.rel (!%p12_p4) target bundleno = 1 (0x1), region = 70 }

</bundles_post_ra>
